<compile_context>
chip_gen: v7x
topology: tpu7x:2x2x1
jax: 0.10.0
libtpu: 0.0.40
codegen_flags: <defaults>
</compile_context>

<pallas_src>
import functools

import jax
import jax.numpy as jnp
from jax.experimental import pallas as pl
from jax.experimental.pallas import tpu as pltpu

NEG_SLOPE = 0.2  # GATConv default negative_slope


# ---------------------------------------------------------------------------
# Fused Pallas kernel
# ---------------------------------------------------------------------------
def _fused_gat_edge_kernel(x_ref, ei_ref, p_ref, out_ref, *,
                           off, heads, hid, n_nodes):
    """Whole GATEdgeClassifier forward, whole graph resident in VMEM.

    x_ref  : [N, F_in]        node features
    ei_ref : [E, 2] int32     (source, target) per edge
    p_ref  : [R, 128] f32     packed parameter / constant slab (layout in `off`)
    out_ref: [E, 128]         lane-dense logits (cols >= out_ch are bias-padded)
    """
    f32 = jnp.float32
    n = n_nodes

    def P(name):               # static carve of a packed tensor (exact width)
        r0, nr, nc = off[name]
        return p_ref[r0:r0 + nr, 0:nc]

    def P_wide(name):          # carve with full 128-lane (zero-padded) width
        r0, nr, _ = off[name]
        return p_ref[r0:r0 + nr, :]

    # ---- edge one-hots + adjacency bias (built in-kernel; shared by both layers) ----
    ei = ei_ref[...]                                                   # [E, 2]
    e_num = ei.shape[0]
    node_ids = jax.lax.broadcasted_iota(jnp.int32, (e_num, n), 1)
    sel_src = (ei[:, 0:1] == node_ids).astype(f32)                     # [E, N] one-hot source
    sel_dst = (ei[:, 1:2] == node_ids).astype(f32)                     # [E, N] one-hot target
    sel_cat = jnp.concatenate([sel_src, sel_dst], axis=1)              # [E, 2N] (epilogue gather)

    adj = jnp.dot(sel_dst.T, sel_src, preferred_element_type=f32)      # adj[t, s] = #edges s->t
    ii = jax.lax.broadcasted_iota(jnp.int32, (n, n), 0)
    jj = jax.lax.broadcasted_iota(jnp.int32, (n, n), 1)
    self_loop = (ii == jj).astype(f32)
    adj_ok = jnp.maximum(adj, self_loop)                               # self loops (GATConv default)
    adj_bias = jnp.where(adj_ok > 0.0, 0.0, -1e30).astype(f32)

    def masked_softmax(e, bias):
        e = jnp.where(e > 0, e, NEG_SLOPE * e) + bias                  # leaky_relu + mask
        e = e - jnp.max(e, axis=-1, keepdims=True)
        p = jnp.exp(e)
        # approx reciprocal runs on the EUP slot; use approx=False if bit-close torch
        # parity is required (negligible perf delta at this size).
        return p * pl.reciprocal(jnp.sum(p, axis=-1, keepdims=True), approx=True)

    # ---- layer 1: GATConv(F_in, hid, heads) -- heads batched, no per-head loop ----
    x = x_ref[...].astype(f32)
    hh = jnp.dot(x, P("w1"), preferred_element_type=f32)               # [N, H*C]
    a1 = jnp.dot(hh, P("sel1"), preferred_element_type=f32)            # [N, 2H] = dst | src logits
    a1T = a1.T                                                         # [2H, N] (single XLU transpose)
    reph = P("reph")                                                   # [H*N, H] head replicator
    rsel = P("rsel")                                                   # [H*N, N] tiled identity
    # sublane-stacked scores: e1[h*N + i, j] = a_dst[i, h] + a_src[j, h]
    dst_rows = jnp.dot(reph, a1T[0:heads, :], preferred_element_type=f32)           # [H*N, N] = a_dst[j, h]
    src_rows = jnp.dot(reph, a1T[heads:2 * heads, :], preferred_element_type=f32)   # [H*N, N] = a_src[j, h]
    dst_col = jnp.sum(dst_rows * rsel, axis=-1, keepdims=True)         # [H*N, 1] = a_dst[i, h]
    e1 = dst_col + src_rows                                            # [H*N, N]
    bias1 = jnp.concatenate([adj_bias] * heads, axis=0)                # [H*N, N]
    alpha1 = masked_softmax(e1, bias1)                                 # [H*N, N] all heads at once
    # aggregation: one big matmul + block-diagonal extraction; h1 stays in registers
    prod = jnp.dot(alpha1, hh, preferred_element_type=f32)             # [H*N, H*C]
    h1 = jnp.dot(P("rselT"), prod * P("blockmask"),
                 preferred_element_type=f32)                           # [N, H*C]
    h1 = jnp.maximum(h1 + P("b1"), 0.0)                                # bias + ReLU fused

    # ---- layer 2: GATConv(H*C, hid), single head ----
    hh2 = jnp.dot(h1, P("w2"), preferred_element_type=f32)             # [N, C]
    a2 = jnp.dot(hh2, P("sel2"), preferred_element_type=f32)           # [N, 2]
    a2T = a2.T                                                         # [2, N] (single transpose)
    e2 = a2[:, 0:1] + a2T[1:2, :]                                      # [N, N]
    alpha2 = masked_softmax(e2, adj_bias)
    h2 = jnp.dot(alpha2, hh2, preferred_element_type=f32) + P("b2")    # [N, C]

    # ---- epilogue: fused edge gather + classifier (one MXU dot, lane-dense store) ----
    p_src = jnp.dot(h2, P_wide("wc_src"), preferred_element_type=f32)  # [N, 128]
    p_dst = jnp.dot(h2, P_wide("wc_dst"), preferred_element_type=f32)  # [N, 128]
    p_cat = jnp.concatenate([p_src, p_dst], axis=0)                    # [2N, 128]
    out = jnp.dot(sel_cat, p_cat, preferred_element_type=f32) + P_wide("bc")
    out_ref[...] = out.astype(out_ref.dtype)


# ---------------------------------------------------------------------------
# Wrapper (one pallas_call; parameter packing / layout plumbing under jit)
# ---------------------------------------------------------------------------
def _full_spec(shape):
    zeros = (0,) * len(shape)
    return pl.BlockSpec(shape, lambda i, _z=zeros: _z)


@jax.jit
def gat_edge_classifier_forward(params, x, edge_index, w_edge):
    # GATConv(edge_dim=None) ignores edge_attr; kept only to mirror the torch signature.
    del w_edge
    n, f_in = x.shape
    heads, _, hid = params["W1"].shape
    hc = heads * hid
    out_ch = params["Wc"].shape[1]
    out_pad = 128                                    # lane-dense output / slab width

    # ---- derived parameter tensors (plain XLA under jit) ----
    w1_all = jnp.transpose(params["W1"], (1, 0, 2)).reshape(f_in, hc)          # [F_in, H*C]
    eye_h = jnp.eye(heads, dtype=jnp.float32)
    dsel = (params["att_dst1"][:, :, None] * eye_h[:, None, :]).reshape(hc, heads)
    ssel = (params["att_src1"][:, :, None] * eye_h[:, None, :]).reshape(hc, heads)
    sel1 = jnp.concatenate([dsel, ssel], axis=1)                               # [H*C, 2H]
    w2_all = params["W2"][0]                                                   # [H*C, C]
    sel2 = jnp.stack([params["att_dst2"][0], params["att_src2"][0]], axis=1)   # [C, 2]
    wc_src, wc_dst = params["Wc"][:hid], params["Wc"][hid:]                    # [C, out_ch] each

    # constant selectors for the sublane-stacked (head-batched) attention
    eye_n = jnp.eye(n, dtype=jnp.float32)
    rsel = jnp.tile(eye_n, (heads, 1))                                         # [H*N, N]
    rselT = jnp.tile(eye_n, (1, heads))                                        # [N, H*N]
    reph = jnp.repeat(eye_h, n, axis=0)                                        # [H*N, H]
    head_row = jnp.repeat(jnp.arange(heads), n)                                # [H*N]
    head_col = jnp.repeat(jnp.arange(heads), hid)                              # [H*C]
    blockmask = (head_row[:, None] == head_col[None, :]).astype(jnp.float32)   # [H*N, H*C]

    # ---- pack everything into ONE lane-dense [R, 128] slab (single prologue DMA) ----
    # Multi-row tensors first (keeps their row offsets 8-aligned), 1-row biases last.
    entries = [
        ("w1", w1_all), ("sel1", sel1), ("w2", w2_all), ("sel2", sel2),
        ("wc_src", wc_src), ("wc_dst", wc_dst),
        ("rsel", rsel), ("rselT", rselT), ("reph", reph), ("blockmask", blockmask),
        ("b1", params["b1"]), ("b2", params["b2"]), ("bc", params["bc"]),
    ]
    off, r = {}, 0
    for name, arr in entries:
        assert arr.ndim == 2 and arr.shape[1] <= out_pad
        off[name] = (r, arr.shape[0], arr.shape[1])
        r += arr.shape[0]
    slab_rows = -(-r // 8) * 8
    slab = jnp.zeros((slab_rows, out_pad), jnp.float32)
    for name, arr in entries:
        r0, nr, nc = off[name]
        slab = slab.at[r0:r0 + nr, 0:nc].set(arr.astype(jnp.float32))

    ei = edge_index.T.astype(jnp.int32)                                        # [E, 2]
    e_num = ei.shape[0]

    kernel = functools.partial(_fused_gat_edge_kernel, off=off,
                               heads=heads, hid=hid, n_nodes=n)
    inputs = (x, ei, slab)

    logits_pad = pl.pallas_call(
        kernel,
        out_shape=jax.ShapeDtypeStruct((e_num, out_pad), jnp.float32),
        grid=(1,),
        in_specs=[_full_spec(a.shape) for a in inputs],
        out_specs=_full_spec((e_num, out_pad)),
        compiler_params=pltpu.CompilerParams(dimension_semantics=("arbitrary",)),
    )(*inputs)
    return logits_pad[:, :out_ch]


# ---------------------------------------------------------------------------
# Main
# ---------------------------------------------------------------------------
if __name__ == "__main__":
    N = 16            # nodes
    IN_CH = 8         # in_channels
    HID = 16          # hidden_channels
    OUT_CH = 4        # out_channels
    HEADS = 4         # heads
    EDGE_DIM = 3      # edge-attr dim (ignored by GATConv with edge_dim=None)

    key = jax.random.PRNGKey(0)
    ks = jax.random.split(key, 12)

    # Deterministic synthetic graph: ring + skip-3 edges, no duplicates, no self loops.
    src = jnp.arange(N, dtype=jnp.int32)
    row = jnp.concatenate([src, src])                       # source nodes
    col = jnp.concatenate([(src + 1) % N, (src + 3) % N])   # target nodes
    edge_index = jnp.stack([row, col])                      # [2, E], E = 32
    E = edge_index.shape[1]

    # Inputs.
    x = jax.random.normal(ks[0], (N, IN_CH), jnp.float32)
    w_edge = jax.random.normal(ks[1], (E, EDGE_DIM), jnp.float32)  # unused (edge_dim=None)

    # Deterministic parameters (shapes follow the PyTorch module __init__).
    params = {
        # conv1: GATConv(IN_CH, HID, heads=HEADS)
        "W1": 0.2 * jax.random.normal(ks[2], (HEADS, IN_CH, HID), jnp.float32),
        "att_src1": 0.2 * jax.random.normal(ks[3], (HEADS, HID), jnp.float32),
        "att_dst1": 0.2 * jax.random.normal(ks[4], (HEADS, HID), jnp.float32),
        "b1": 0.05 * jax.random.normal(ks[5], (1, HEADS * HID), jnp.float32),
        # conv2: GATConv(HID*HEADS, HID)  (heads=1)
        "W2": 0.2 * jax.random.normal(ks[6], (1, HEADS * HID, HID), jnp.float32),
        "att_src2": 0.2 * jax.random.normal(ks[7], (1, HID), jnp.float32),
        "att_dst2": 0.2 * jax.random.normal(ks[8], (1, HID), jnp.float32),
        "b2": 0.05 * jax.random.normal(ks[9], (1, HID), jnp.float32),
        # classifier: Linear(2*HID, OUT_CH)
        "Wc": 0.2 * jax.random.normal(ks[10], (2 * HID, OUT_CH), jnp.float32),
        "bc": 0.05 * jax.random.normal(ks[11], (1, OUT_CH), jnp.float32),
    }

    logits = gat_edge_classifier_forward(params, x, edge_index, w_edge)
    logits = jax.block_until_ready(logits)
    assert logits.shape == (E, OUT_CH) and logits.dtype == jnp.float32
    assert bool(jnp.all(jnp.isfinite(logits)))
    print("KERNEL_OK")
</pallas_src>

<mosaic_0001>
module attributes {stable_mosaic.version = 11 : i64} {
  func.func @_fused_gat_edge_kernel(%arg0: i32, %arg1: memref<16x8xf32, #tpu.memory_space<vmem>>, %arg2: memref<32x2xi32, #tpu.memory_space<vmem>>, %arg3: memref<400x128xf32, #tpu.memory_space<vmem>>, %arg4: memref<32x128xf32, #tpu.memory_space<vmem>>) attributes {dimension_semantics = [#tpu.dimension_semantics<arbitrary>], iteration_bounds = array<i64: 1>, scalar_prefetch = 0 : i64, scratch_operands = 0 : i64, tpu.core_type = #tpu.core_type<tc>, window_params = [{pipeline_mode = #tpu.pipeline_mode<synchronous>, transform_indices = @transform_0, window_bounds = array<i64: 16, 8>}, {pipeline_mode = #tpu.pipeline_mode<synchronous>, transform_indices = @transform_1, window_bounds = array<i64: 32, 2>}, {pipeline_mode = #tpu.pipeline_mode<synchronous>, transform_indices = @transform_2, window_bounds = array<i64: 400, 128>}, {pipeline_mode = #tpu.pipeline_mode<synchronous>, transform_indices = @transform_3, window_bounds = array<i64: 32, 128>}]} {
    %c0 = arith.constant 0 : index
    %c0_0 = arith.constant 0 : index
    %0 = vector.load %arg2[%c0, %c0_0] : memref<32x2xi32, #tpu.memory_space<vmem>>, vector<32x2xi32>
    %1 = tpu.iota {dimensions = array<i32: 1>} : vector<32x16xi32>
    %2 = vector.extract_strided_slice %0 {offsets = [0, 0], sizes = [32, 1], strides = [1, 1]} : vector<32x2xi32> to vector<32x1xi32>
    %3 = vector.broadcast %2 : vector<32x1xi32> to vector<32x16xi32>
    %4 = arith.cmpi eq, %3, %1 : vector<32x16xi32>
    %5 = arith.extui %4 : vector<32x16xi1> to vector<32x16xi32>
    %6 = arith.sitofp %5 : vector<32x16xi32> to vector<32x16xf32>
    %7 = vector.extract_strided_slice %0 {offsets = [0, 1], sizes = [32, 1], strides = [1, 1]} : vector<32x2xi32> to vector<32x1xi32>
    %8 = vector.broadcast %7 : vector<32x1xi32> to vector<32x16xi32>
    %9 = arith.cmpi eq, %8, %1 : vector<32x16xi32>
    %10 = arith.extui %9 : vector<32x16xi1> to vector<32x16xi32>
    %11 = arith.sitofp %10 : vector<32x16xi32> to vector<32x16xf32>
    %12 = tpu.concatenate %6, %11 in 1 : vector<32x16xf32>, vector<32x16xf32> -> vector<32x32xf32>
    %13 = tpu.transpose %11, [1, 0] : vector<32x16xf32> -> vector<16x32xf32>
    %cst = arith.constant dense<0.000000e+00> : vector<16x16xf32>
    %14 = tpu.matmul %13, %6, %cst {dimension_numbers = #tpu.dot_dimension_numbers<[1], [0], [0], [1], [0, 0, 1, 1], [], []>} : vector<16x32xf32>, vector<32x16xf32>, vector<16x16xf32> -> vector<16x16xf32>
    %15 = tpu.iota {dimensions = array<i32: 0>} : vector<16x16xi32>
    %16 = tpu.iota {dimensions = array<i32: 1>} : vector<16x16xi32>
    %17 = arith.cmpi eq, %15, %16 : vector<16x16xi32>
    %18 = arith.extui %17 : vector<16x16xi1> to vector<16x16xi32>
    %19 = arith.sitofp %18 : vector<16x16xi32> to vector<16x16xf32>
    %20 = arith.maximumf %14, %19 : vector<16x16xf32>
    %cst_1 = arith.constant 0.000000e+00 : f32
    %21 = vector.broadcast %cst_1 : f32 to vector<16x16xf32>
    %22 = arith.cmpf ogt, %20, %21 : vector<16x16xf32>
    %cst_2 = arith.constant 0.000000e+00 : f32
    %cst_3 = arith.constant -1.000000e+30 : f32
    %23 = vector.broadcast %cst_2 : f32 to vector<16x16xf32>
    %24 = vector.broadcast %cst_3 : f32 to vector<16x16xf32>
    %25 = arith.select %22, %23, %24 : vector<16x16xi1>, vector<16x16xf32>
    %c0_4 = arith.constant 0 : index
    %c0_5 = arith.constant 0 : index
    %26 = vector.load %arg1[%c0_4, %c0_5] : memref<16x8xf32, #tpu.memory_space<vmem>>, vector<16x8xf32>
    %c0_6 = arith.constant 0 : index
    %c0_7 = arith.constant 0 : index
    %27 = vector.load %arg3[%c0_6, %c0_7] : memref<400x128xf32, #tpu.memory_space<vmem>>, vector<8x64xf32>
    %cst_8 = arith.constant dense<0.000000e+00> : vector<16x64xf32>
    %28 = tpu.matmul %26, %27, %cst_8 {dimension_numbers = #tpu.dot_dimension_numbers<[1], [0], [0], [1], [0, 0, 1, 1], [], []>} : vector<16x8xf32>, vector<8x64xf32>, vector<16x64xf32> -> vector<16x64xf32>
    %c8 = arith.constant 8 : index
    %c0_9 = arith.constant 0 : index
    %29 = vector.load %arg3[%c8, %c0_9] : memref<400x128xf32, #tpu.memory_space<vmem>>, vector<64x8xf32>
    %cst_10 = arith.constant dense<0.000000e+00> : vector<16x8xf32>
    %30 = tpu.matmul %28, %29, %cst_10 {dimension_numbers = #tpu.dot_dimension_numbers<[1], [0], [0], [1], [0, 0, 1, 1], [], []>} : vector<16x64xf32>, vector<64x8xf32>, vector<16x8xf32> -> vector<16x8xf32>
    %31 = tpu.transpose %30, [1, 0] : vector<16x8xf32> -> vector<8x16xf32>
    %c264 = arith.constant 264 : index
    %c0_11 = arith.constant 0 : index
    %32 = vector.load %arg3[%c264, %c0_11] : memref<400x128xf32, #tpu.memory_space<vmem>>, vector<64x4xf32>
    %c184 = arith.constant 184 : index
    %c0_12 = arith.constant 0 : index
    %33 = vector.load %arg3[%c184, %c0_12] : memref<400x128xf32, #tpu.memory_space<vmem>>, vector<64x16xf32>
    %34 = vector.extract_strided_slice %31 {offsets = [0, 0], sizes = [4, 16], strides = [1, 1]} : vector<8x16xf32> to vector<4x16xf32>
    %cst_13 = arith.constant dense<0.000000e+00> : vector<64x16xf32>
    %35 = tpu.matmul %32, %34, %cst_13 {dimension_numbers = #tpu.dot_dimension_numbers<[1], [0], [0], [1], [0, 0, 1, 1], [], []>} : vector<64x4xf32>, vector<4x16xf32>, vector<64x16xf32> -> vector<64x16xf32>
    %36 = vector.extract_strided_slice %31 {offsets = [4, 0], sizes = [4, 16], strides = [1, 1]} : vector<8x16xf32> to vector<4x16xf32>
    %cst_14 = arith.constant dense<0.000000e+00> : vector<64x16xf32>
    %37 = tpu.matmul %32, %36, %cst_14 {dimension_numbers = #tpu.dot_dimension_numbers<[1], [0], [0], [1], [0, 0, 1, 1], [], []>} : vector<64x4xf32>, vector<4x16xf32>, vector<64x16xf32> -> vector<64x16xf32>
    %38 = arith.mulf %35, %33 : vector<64x16xf32>
    %cst_15 = arith.constant dense<0.000000e+00> : vector<64xf32>
    %39 = vector.multi_reduction <add>, %38, %cst_15 [1] : vector<64x16xf32> to vector<64xf32>
    %40 = vector.shape_cast %39 : vector<64xf32> to vector<64x1xf32>
    %41 = vector.broadcast %40 : vector<64x1xf32> to vector<64x16xf32>
    %42 = arith.addf %41, %37 : vector<64x16xf32>
    %43 = tpu.concatenate %25, %25, %25, %25 in 0 : vector<16x16xf32>, vector<16x16xf32>, vector<16x16xf32>, vector<16x16xf32> -> vector<64x16xf32>
    %cst_16 = arith.constant 0.000000e+00 : f32
    %44 = vector.broadcast %cst_16 : f32 to vector<64x16xf32>
    %45 = arith.cmpf ogt, %42, %44 : vector<64x16xf32>
    %cst_17 = arith.constant 2.000000e-01 : f32
    %46 = vector.broadcast %cst_17 : f32 to vector<64x16xf32>
    %47 = arith.mulf %46, %42 : vector<64x16xf32>
    %48 = arith.select %45, %42, %47 : vector<64x16xi1>, vector<64x16xf32>
    %49 = arith.addf %48, %43 : vector<64x16xf32>
    %cst_18 = arith.constant dense<0xFF800000> : vector<64xf32>
    %50 = vector.multi_reduction <maximumf>, %49, %cst_18 [1] : vector<64x16xf32> to vector<64xf32>
    %51 = vector.shape_cast %50 : vector<64xf32> to vector<64x1xf32>
    %52 = vector.broadcast %51 : vector<64x1xf32> to vector<64x16xf32>
    %53 = arith.subf %49, %52 : vector<64x16xf32>
    %54 = math.exp %53 : vector<64x16xf32>
    %cst_19 = arith.constant dense<0.000000e+00> : vector<64xf32>
    %55 = vector.multi_reduction <add>, %54, %cst_19 [1] : vector<64x16xf32> to vector<64xf32>
    %56 = vector.shape_cast %55 : vector<64xf32> to vector<64x1xf32>
    %57 = tpu.reciprocal %56 {approx = true} : vector<64x1xf32> -> vector<64x1xf32>
    %58 = vector.broadcast %57 : vector<64x1xf32> to vector<64x16xf32>
    %59 = arith.mulf %54, %58 : vector<64x16xf32>
    %cst_20 = arith.constant dense<0.000000e+00> : vector<64x64xf32>
    %60 = tpu.matmul %59, %28, %cst_20 {dimension_numbers = #tpu.dot_dimension_numbers<[1], [0], [0], [1], [0, 0, 1, 1], [], []>} : vector<64x16xf32>, vector<16x64xf32>, vector<64x64xf32> -> vector<64x64xf32>
    %c248 = arith.constant 248 : index
    %c0_21 = arith.constant 0 : index
    %61 = vector.load %arg3[%c248, %c0_21] : memref<400x128xf32, #tpu.memory_space<vmem>>, vector<16x64xf32>
    %c328 = arith.constant 328 : index
    %c0_22 = arith.constant 0 : index
    %62 = vector.load %arg3[%c328, %c0_22] : memref<400x128xf32, #tpu.memory_space<vmem>>, vector<64x64xf32>
    %63 = arith.mulf %60, %62 : vector<64x64xf32>
    %cst_23 = arith.constant dense<0.000000e+00> : vector<16x64xf32>
    %64 = tpu.matmul %61, %63, %cst_23 {dimension_numbers = #tpu.dot_dimension_numbers<[1], [0], [0], [1], [0, 0, 1, 1], [], []>} : vector<16x64xf32>, vector<64x64xf32>, vector<16x64xf32> -> vector<16x64xf32>
    %c392 = arith.constant 392 : index
    %c0_24 = arith.constant 0 : index
    %65 = vector.load %arg3[%c392, %c0_24] : memref<400x128xf32, #tpu.memory_space<vmem>>, vector<1x64xf32>
    %66 = vector.broadcast %65 : vector<1x64xf32> to vector<16x64xf32>
    %67 = arith.addf %64, %66 : vector<16x64xf32>
    %cst_25 = arith.constant 0.000000e+00 : f32
    %68 = vector.broadcast %cst_25 : f32 to vector<16x64xf32>
    %69 = arith.maximumf %67, %68 : vector<16x64xf32>
    %c72 = arith.constant 72 : index
    %c0_26 = arith.constant 0 : index
    %70 = vector.load %arg3[%c72, %c0_26] : memref<400x128xf32, #tpu.memory_space<vmem>>, vector<64x16xf32>
    %cst_27 = arith.constant dense<0.000000e+00> : vector<16x16xf32>
    %71 = tpu.matmul %69, %70, %cst_27 {dimension_numbers = #tpu.dot_dimension_numbers<[1], [0], [0], [1], [0, 0, 1, 1], [], []>} : vector<16x64xf32>, vector<64x16xf32>, vector<16x16xf32> -> vector<16x16xf32>
    %c136 = arith.constant 136 : index
    %c0_28 = arith.constant 0 : index
    %72 = vector.load %arg3[%c136, %c0_28] : memref<400x128xf32, #tpu.memory_space<vmem>>, vector<16x2xf32>
    %cst_29 = arith.constant dense<0.000000e+00> : vector<16x2xf32>
    %73 = tpu.matmul %71, %72, %cst_29 {dimension_numbers = #tpu.dot_dimension_numbers<[1], [0], [0], [1], [0, 0, 1, 1], [], []>} : vector<16x16xf32>, vector<16x2xf32>, vector<16x2xf32> -> vector<16x2xf32>
    %74 = tpu.transpose %73, [1, 0] : vector<16x2xf32> -> vector<2x16xf32>
    %75 = vector.extract_strided_slice %73 {offsets = [0, 0], sizes = [16, 1], strides = [1, 1]} : vector<16x2xf32> to vector<16x1xf32>
    %76 = vector.extract_strided_slice %74 {offsets = [1, 0], sizes = [1, 16], strides = [1, 1]} : vector<2x16xf32> to vector<1x16xf32>
    %77 = vector.broadcast %75 : vector<16x1xf32> to vector<16x16xf32>
    %78 = vector.broadcast %76 : vector<1x16xf32> to vector<16x16xf32>
    %79 = arith.addf %77, %78 : vector<16x16xf32>
    %cst_30 = arith.constant 0.000000e+00 : f32
    %80 = vector.broadcast %cst_30 : f32 to vector<16x16xf32>
    %81 = arith.cmpf ogt, %79, %80 : vector<16x16xf32>
    %cst_31 = arith.constant 2.000000e-01 : f32
    %82 = vector.broadcast %cst_31 : f32 to vector<16x16xf32>
    %83 = arith.mulf %82, %79 : vector<16x16xf32>
    %84 = arith.select %81, %79, %83 : vector<16x16xi1>, vector<16x16xf32>
    %85 = arith.addf %84, %25 : vector<16x16xf32>
    %cst_32 = arith.constant dense<0xFF800000> : vector<16xf32>
    %86 = vector.multi_reduction <maximumf>, %85, %cst_32 [1] : vector<16x16xf32> to vector<16xf32>
    %87 = vector.shape_cast %86 : vector<16xf32> to vector<16x1xf32>
    %88 = vector.broadcast %87 : vector<16x1xf32> to vector<16x16xf32>
    %89 = arith.subf %85, %88 : vector<16x16xf32>
    %90 = math.exp %89 : vector<16x16xf32>
    %cst_33 = arith.constant dense<0.000000e+00> : vector<16xf32>
    %91 = vector.multi_reduction <add>, %90, %cst_33 [1] : vector<16x16xf32> to vector<16xf32>
    %92 = vector.shape_cast %91 : vector<16xf32> to vector<16x1xf32>
    %93 = tpu.reciprocal %92 {approx = true} : vector<16x1xf32> -> vector<16x1xf32>
    %94 = vector.broadcast %93 : vector<16x1xf32> to vector<16x16xf32>
    %95 = arith.mulf %90, %94 : vector<16x16xf32>
    %cst_34 = arith.constant dense<0.000000e+00> : vector<16x16xf32>
    %96 = tpu.matmul %95, %71, %cst_34 {dimension_numbers = #tpu.dot_dimension_numbers<[1], [0], [0], [1], [0, 0, 1, 1], [], []>} : vector<16x16xf32>, vector<16x16xf32>, vector<16x16xf32> -> vector<16x16xf32>
    %c393 = arith.constant 393 : index
    %c0_35 = arith.constant 0 : index
    %97 = vector.load %arg3[%c393, %c0_35] : memref<400x128xf32, #tpu.memory_space<vmem>>, vector<1x16xf32>
    %98 = vector.broadcast %97 : vector<1x16xf32> to vector<16x16xf32>
    %99 = arith.addf %96, %98 : vector<16x16xf32>
    %c152 = arith.constant 152 : index
    %c0_36 = arith.constant 0 : index
    %100 = vector.load %arg3[%c152, %c0_36] : memref<400x128xf32, #tpu.memory_space<vmem>>, vector<16x128xf32>
    %cst_37 = arith.constant dense<0.000000e+00> : vector<16x128xf32>
    %101 = tpu.matmul %99, %100, %cst_37 {dimension_numbers = #tpu.dot_dimension_numbers<[1], [0], [0], [1], [0, 0, 1, 1], [], []>} : vector<16x16xf32>, vector<16x128xf32>, vector<16x128xf32> -> vector<16x128xf32>
    %c168 = arith.constant 168 : index
    %c0_38 = arith.constant 0 : index
    %102 = vector.load %arg3[%c168, %c0_38] : memref<400x128xf32, #tpu.memory_space<vmem>>, vector<16x128xf32>
    %cst_39 = arith.constant dense<0.000000e+00> : vector<16x128xf32>
    %103 = tpu.matmul %99, %102, %cst_39 {dimension_numbers = #tpu.dot_dimension_numbers<[1], [0], [0], [1], [0, 0, 1, 1], [], []>} : vector<16x16xf32>, vector<16x128xf32>, vector<16x128xf32> -> vector<16x128xf32>
    %104 = tpu.concatenate %101, %103 in 0 : vector<16x128xf32>, vector<16x128xf32> -> vector<32x128xf32>
    %cst_40 = arith.constant dense<0.000000e+00> : vector<32x128xf32>
    %105 = tpu.matmul %12, %104, %cst_40 {dimension_numbers = #tpu.dot_dimension_numbers<[1], [0], [0], [1], [0, 0, 1, 1], [], []>} : vector<32x32xf32>, vector<32x128xf32>, vector<32x128xf32> -> vector<32x128xf32>
    %c394 = arith.constant 394 : index
    %c0_41 = arith.constant 0 : index
    %106 = vector.load %arg3[%c394, %c0_41] : memref<400x128xf32, #tpu.memory_space<vmem>>, vector<1x128xf32>
    %107 = vector.broadcast %106 : vector<1x128xf32> to vector<32x128xf32>
    %108 = arith.addf %105, %107 : vector<32x128xf32>
    %c0_42 = arith.constant 0 : index
    %c0_43 = arith.constant 0 : index
    %109 = vector.load %arg4[%c0_42, %c0_43] : memref<32x128xf32, #tpu.memory_space<vmem>>, vector<32x128xf32>
    tpu.vector_store %arg4[%c0_42, %c0_43], %108 {strides = array<i32>} : memref<32x128xf32, #tpu.memory_space<vmem>>, vector<32x128xf32>,
    return
  }
  func.func @transform_0(%arg0: i32) -> (i32, i32) {
    %c0_i32 = arith.constant 0 : i32
    %c0_i32_0 = arith.constant 0 : i32
    %c0_i32_1 = arith.constant 0 : i32
    return %c0_i32, %c0_i32_0 : i32, i32
  }
  func.func @transform_1(%arg0: i32) -> (i32, i32) {
    %c0_i32 = arith.constant 0 : i32
    %c0_i32_0 = arith.constant 0 : i32
    %c0_i32_1 = arith.constant 0 : i32
    return %c0_i32, %c0_i32_0 : i32, i32
  }
  func.func @transform_2(%arg0: i32) -> (i32, i32) {
    %c0_i32 = arith.constant 0 : i32
    %c0_i32_0 = arith.constant 0 : i32
    %c0_i32_1 = arith.constant 0 : i32
    return %c0_i32, %c0_i32_0 : i32, i32
  }
  func.func @transform_3(%arg0: i32) -> (i32, i32) {
    %c0_i32 = arith.constant 0 : i32
    %c0_i32_0 = arith.constant 0 : i32
    %c0_i32_1 = arith.constant 0 : i32
    return %c0_i32, %c0_i32_0 : i32, i32
  }
}

</mosaic_0001>

<bundles_post_ra>
// kernel: eq.12
= control target key start
LH: loop header
LB: loop body
LE: loop exit
PB: predicated region body
PF: predicated region fallthrough
CT: control target
= control target key end

     0   :  { %vm7_vm0 = vcmask 130048   ;;  %s37_s8 = smov 16   ;;  %s38_s9 = smov 32   ;;  %vm13_vm1 = vcmask 523648   ;;  %vm19_vm2 = vcmask 392448   ;;  %vm25_vm3 = vcmask 261248   ;;  %s55_s0 = inlined_call_operand.vmem [shape: s32[4,16], index: 0, kind: input, shape index: {}]   ;;  %s56_s1 = inlined_call_operand.vmem [shape: s32[64], index: 1, kind: output, shape index: {}]  }
   0x1   :  { %v4_v0 = vld [vmem:[%s55_s0] sm:$0xf]  ;;  %s36_s0 = smov 48  }
   0x2   :  { %5 = vst [vmem:[#allocation1] sm:$0xf] %v4_v0 }
   0x9   :  { %v10_v1 = vld [vmem:[#allocation1 + $0x3] sm:$0x1]   ;;  %v22_v2 = vld [vmem:[#allocation1 + $0x1] sm:$0x1]   ;;  %v6_v3 = vld [vmem:[#allocation1] sm:$0x1]  }
   0xa   :  { %11 = vrot.lane.b32.xlu0 %v10_v1, %s36_s0  ;;  %23 = vrot.lane.b32.xlu1 %v22_v2, %s37_s8  ;;  %v16_v4 = vld [vmem:[#allocation1 + $0x2] sm:$0x1]   ;;  %8 = vst.msk [vmem:[#allocation0] sm:$0x1] %vm7_vm0, %v6_v3  }
   0xe   :  { %17 = vrot.lane.b32.xlu0 %v16_v4, %s38_s9 }
  0x7c   :  { %v12_v5 = vpop.permute.xlu0 %11   ;;  %v24_v6 = vpop.permute.xlu1 %23  }
  0x7d   :  { %14 = vst.msk [vmem:[#allocation0] sm:$0x1] %vm13_vm1, %v12_v5  }
  0x80   :  { %v18_v7 = vpop.permute.xlu0 %17  }
  0x81   :  { %20 = vst.msk [vmem:[#allocation0] sm:$0x1] %vm19_vm2, %v18_v7  }
  0x82   :  { %26 = vst.msk [vmem:[#allocation0] sm:$0x1] %vm25_vm3, %v24_v6  }
  0x89   :  { %v30_v8 = vld [vmem:[#allocation0] sm:$0x1] }
  0x8a   :  { %32 = vst [vmem:[%s56_s1] sm:$0x1] %v30_v8 }

// kernel: gat_edge_classifier_forward.1
= control target key start
LH: loop header
LB: loop body
LE: loop exit
PB: predicated region body
PF: predicated region fallthrough
CT: control target
= control target key end

     0   :  { %vm221_vm0 = vcmask 64512   ;;  %v2144_v3 = vmov 1   ;;  %v2145_v20 = vmov 0   ;;  %v18_v21 = vlaneseq  ;;  %s2148_s15 = smov 124   ;;  %s2150_s29 = smov 16   ;;  %s2559_s2 = inlined_call_operand.vmem [shape: f32[400,128], index: 2, kind: input, shape index: {}]   ;;  %s2560_s0 = inlined_call_operand.vmem [shape: f32[16,8], index: 0, kind: input, shape index: {}]   ;;  %s2561_s1 = inlined_call_operand.vmem [shape: s32[32,2], index: 1, kind: input, shape index: {}]   ;;  %s2562_s3 = inlined_call_operand.vmem [shape: f32[32,128], index: 3, kind: output, shape index: {}]  }
   0x1   :  { %v220_v0 = vld [vmem:[%s2559_s2] sm:$0xff]  ;;  %v219_v2 = vld [vmem:[%s2560_s0 + $0x8] sm:$0xff]  ;;  %2085 = vset.pattern.permute.xlu0 %v2144_v3  ;;  %2086 = vset.pattern.permute.xlu1 %v2144_v3  ;;  %v16_v5 = vld [vmem:[%s2561_s1 + $0x10] sm:$0xff]  ;;  %v2146_v25 = vmov 0.0   ;;  %vm311_vm5 = vcmask 523264   ;;  %vm121_vm12 = vcmask 261120  }
   0x2   :  { %v218_v1 = vld [vmem:[%s2560_s0] sm:$0xff]  ;;  %1830 = vmatprep.subr.mxu1 %v220_v0  ;;  %v303_v6 = vld [vmem:[%s2559_s2 + $0x8] sm:$0xff]  ;;  %v304_v7 = vld [vmem:[%s2559_s2 + $0x10] sm:$0xff]  ;;  %51 = vperm.xlu1 %2086, %v16_v5   ;;  %v2219_v22 = vand.u32 127, %v18_v21  ;;  %v2147_v39 = vmov 1.0|1.0  }
   0x3   :  { %1832 = vmatprep.mubr.msk.f32.mxu1 %vm221_vm0, %v218_v1  ;;  %v14_v4 = vld [vmem:[%s2561_s1] sm:$0xff]  ;;  %1831 = vmatpush3.msra.mxu1 %v220_v0  ;;  %v15_v8 = vld [vmem:[%s2561_s1 + $0x8] sm:$0xff]  ;;  %v1990_v9 = vpack.c.bf16 %v304_v7, %v303_v6  ;;  %v305_v10 = vld [vmem:[%s2559_s2 + $0x18] sm:$0xff]  ;;  %vm409_vm13 = vcmask 31744   ;;  %vm84_vm15 = vcmask 130048  }
   0x4   :  { %45 = vperm.xlu0 %2085, %v14_v4   ;;  %1833 = vmatmul.mubr.msk.f32.vlgmr.msra.gmra.mrb[0].mxu1 %vm221_vm0, %v219_v2  ;;  %v306_v11 = vld [vmem:[%s2559_s2 + $0x20] sm:$0xff]  ;;  %v17_v12 = vld [vmem:[%s2561_s1 + $0x18] sm:$0xff]  ;;  %v307_v14 = vld [vmem:[%s2559_s2 + $0x28] sm:$0xff] }
   0x5   :  { %v1994_v13 = vpack.c.bf16 %v306_v11, %v305_v10  ;;  %v308_v15 = vld [vmem:[%s2559_s2 + $0x30] sm:$0xff]  ;;  %1991 = vmatprep.subr.bf16.mxu1 %v1990_v9  ;;  %v309_v17 = vld [vmem:[%s2559_s2 + $0x38] sm:$0xff]  ;;  %v310_v18 = vld [vmem:[%s2559_s2 + $0x40] sm:$0xff] }
   0x6   :  { %1993 = vmatpush3.bf16.msra.mxu1 %v1990_v9  ;;  %54 = vperm.xlu1 %2086, %v17_v12   ;;  %v1998_v16 = vpack.c.bf16 %v308_v15, %v307_v14  ;;  %v2002_v19 = vpack.c.bf16 %v310_v18, %v309_v17  ;;  %v393_v44 = vld [vmem:[%s2559_s2 + $0x108] sm:$0xff]  ;;  %vm2284_vm14 = vmpackc.low %vm409_vm13, %vm409_vm13  ;;  %v394_v50 = vld [vmem:[%s2559_s2 + $0x110] sm:$0xff] }
   0x7   :  { %1995 = vmatprep.subr.bf16.mxu1 %v1994_v13  ;;  %v395_v51 = vld [vmem:[%s2559_s2 + $0x118] sm:$0xff]  ;;  %v396_v52 = vld [vmem:[%s2559_s2 + $0x120] sm:$0xff]  ;;  %v397_v53 = vld [vmem:[%s2559_s2 + $0x128] sm:$0xff] }
   0x8   :  { %48 = vperm.xlu0 %2085, %v15_v8   ;;  %v398_v54 = vld [vmem:[%s2559_s2 + $0x130] sm:$0xff]  ;;  %v399_v55 = vld [vmem:[%s2559_s2 + $0x138] sm:$0xff]  ;;  %v400_v56 = vld [vmem:[%s2559_s2 + $0x140] sm:$0xff] }
   0x9   :  { %v402_v63 = vld [vmem:[%s2559_s2 + $0xc0] sm:$0xff]  ;;  %v401_v1 = vld [vmem:[%s2559_s2 + $0xb8] sm:$0xff] }
   0xa   :  { %1997 = vmatpush3.bf16.msra.mxu1 %v1994_v13  ;;  %2088 = vset.pattern.permute.xlu1 %v2145_v20  ;;  %v406_v10 = vld [vmem:[%s2559_s2 + $0xe0] sm:$0xff]  ;;  %v405_v17 = vld [vmem:[%s2559_s2 + $0xd8] sm:$0xff] }
   0xb   :  { %1999 = vmatprep.subr.bf16.mxu1 %v1998_v16  ;;  %24 = vperm.xlu1 %2088, %v15_v8  }
   0xc   :  { %2087 = vset.pattern.permute.xlu0 %v2145_v20 }
   0xd   :  { %21 = vperm.xlu0 %2087, %v14_v4   ;;  %v404_v4 = vld [vmem:[%s2559_s2 + $0xd0] sm:$0xff] }
   0xe   :  { %2001 = vmatpush3.bf16.msra.mxu1 %v1998_v16 }
   0xf   :  { %2003 = vmatprep.subr.bf16.mxu1 %v2002_v19  ;;  %27 = vperm.xlu1 %2088, %v16_v5  }
  0x11   :  { %30 = vperm.xlu0 %2087, %v17_v12   ;;  %v403_v12 = vld [vmem:[%s2559_s2 + $0xc8] sm:$0xff] }
  0x12   :  { %2005 = vmatpush3.bf16.msra.mxu1 %v2002_v19 }
  0x81   :  { %v52_v24 = vpop.permute.xlu1 %51 }
  0x82   :  { %vm58_vm2 = vcmp.eq.s32.totalorder %v52_v24, %v2219_v22 }
  0x83   :  { %v46_v23 = vpop.permute.xlu0 %45  ;;  %v2235_v31 = vsel %vm58_vm2, 1.0, %v2146_v25 }
  0x84   :  { %vm56_vm1 = vcmp.eq.s32.totalorder %v46_v23, %v2219_v22 }
  0x85   :  { %v2223_v26 = vsel %vm56_vm1, 1.0, %v2146_v25  ;;  %v55_v28 = vpop.permute.xlu1 %54 }
  0x86   :  { %vm59_vm4 = vcmp.eq.s32.totalorder %v55_v28, %v2219_v22  ;;  %89 = vxpose.xlu1.b32.start [1/4] (short) (narrow) %v2223_v26, 16 }
  0x87   :  { %v49_v27 = vpop.permute.xlu0 %48  ;;  %v2238_v32 = vsel %vm59_vm4, 1.0, %v2146_v25 }
  0x88   :  { %vm57_vm3 = vcmp.eq.s32.totalorder %v49_v27, %v2219_v22  ;;  %v2099_v33 = vpack.i.bf16 %v2238_v32, %v2235_v31  ;;  %v407_v27 = vld [vmem:[%s2559_s2 + $0xe8] sm:$0xff] }
  0x89   :  { %v2228_v29 = vsel %vm57_vm3, 1.0, %v2146_v25 }
  0x8a   :  { %v2094_v30 = vpack.i.bf16 %v2228_v29, %v2223_v26  ;;  %90 = vxpose.xlu1.b32.cont [2/4] (short) (narrow) %v2228_v29, 16  ;;  %v2247_v37 = vpop.permute.xlu1 %24 }
  0x8b   :  { %vm33_vm6 = vcmp.eq.s32.totalorder %v2247_v37, %v2219_v22  ;;  %v1389_v37 = vld [vmem:[%s2559_s2 + $0x98] sm:$0xff] }
  0x8c   :  { %v2249_v38 = vpop.permute.xlu0 %21 }
  0x8d   :  { %vm32_vm7 = vcmp.eq.s32.totalorder %v2249_v38, %v2219_v22  ;;  %v1390_v38 = vld [vmem:[%s2559_s2 + $0xa0] sm:$0xff] }
  0x8e   :  { %91 = vxpose.xlu1.b32.cont [3/4] (short) (narrow) %v2235_v31, 16  ;;  %vm1982_vm8 = vmpackc.low %vm33_vm6, %vm32_vm7  ;;  %v2261_v40 = vpop.permute.xlu1 %27  ;;  %v1659_v26 = vsel %vm32_vm7, 1.0, %v2146_v25 }
  0x8f   :  { %1983 = vmatprep.subr.msk.bf16.mxu0 %vm1982_vm8, %v2147_v39  ;;  %vm34_vm9 = vcmp.eq.s32.totalorder %v2261_v40, %v2219_v22  ;;  %v1721_v40 = vld [vmem:[%s2559_s2 + $0x18a] ss:$0 sm:$0xff] }
  0x90   :  { %1985 = vmatpush3.bf16.msk.msra.mxu0 %vm1982_vm8, %v2147_v39  ;;  %v2263_v41 = vpop.permute.xlu0 %30 }
  0x91   :  { %vm35_vm10 = vcmp.eq.s32.totalorder %v2263_v41, %v2219_v22 }
  0x92   :  { %92 = vxpose.xlu1.b32.end [4/4] (short) (narrow) %v2238_v32, 16  ;;  %vm1986_vm11 = vmpackc.low %vm35_vm10, %vm34_vm9 }
  0x93   :  { %1987 = vmatprep.subr.msk.bf16.mxu0 %vm1986_vm11, %v2147_v39 }
  0x94   :  { %1989 = vmatpush3.bf16.msk.msra.mxu0 %vm1986_vm11, %v2147_v39 }
  0xd7   :  { %v1834_v34 = vpop.f32.mrb[0].mxu1 }
  0xd8   :  { %v294_v35 = vpop.f32.mrb[1].mxu1 }
  0xd9   :  { %v2018_v36 = vpack.c.bf16 %v1834_v34, %v294_v35  ;;  %1851 = vmatprep.mubr.msk.f32.mxu1 %vm311_vm5, %v294_v35 }
  0xda   :  { %1852 = vmatmul.mubr.msk.f32.vlgmr.msra.gmra.mrb[2].mxu1 %vm311_vm5, %v1834_v34 }
  0xdb   :  { %1874 = vmatprep.mubr.msk.f32.mxu1 %vm409_vm13, %v393_v44 }
 0x106   :  { %v105_v42 = vpop.trf.xlu1 }
 0x107   :  { %1827 = vmatprep.mubr.msk.f32.mxu0 %vm121_vm12, %v105_v42 }
 0x10a   :  { %v106_v43 = vpop.trf.xlu1 }
 0x10b   :  { %1828 = vmatmul.mubr.msk.f32.vlgmr.msra.gmra.mrb[0].mxu0 %vm121_vm12, %v106_v43 }
 0x10c   :  { %1858 = vmatprep.mubr.msk.f32.mxu0 %vm409_vm13, %v393_v44 }
 0x1ad   :  { %v1853_v45 = vpop.f32.mrb[2].mxu1 }
 0x1ae   :  { %v384_v46 = vpop.f32.mrb[3].mxu1 }
 0x1af   :  { %v2089_v48 = vpack.i.bf16 %v1853_v45, %v384_v46  ;;  %v2006_v49 = vpack.c.bf16 %v1853_v45, %v384_v46 }
 0x1b1   :  { %2090 = vrot.lane.b32.xlu0 %v2089_v48, %s2148_s15  ;;  %2008 = vmatprep.subr.msk.bf16.mxu0 %vm2284_vm14, %v2006_v49 }
 0x1b2   :  { %2011 = vmatpush3.bf16.xpose.msk.msra.mxu0 %vm2284_vm14, %v2006_v49 }
 0x1b3   :  { %2019 = vmatprep.subr.bf16.mxu0 %v2018_v36 }
 0x1b9   :  { %1859 = vmatmul.mubr.msk.f32.vlgmr.msra.gmra.mrb[2].mxu0 %vm409_vm13, %v394_v50 }
 0x1ba   :  { %2021 = vmatpush3.bf16.msra.mxu0 %v2018_v36  ;;  %1861 = vmatprep.mubr.msk.f32.mxu0 %vm409_vm13, %v395_v51  ;;  %v408_v36 = vld [vmem:[%s2559_s2 + $0xf0] sm:$0xff] }
 0x1bd   :  { %1862 = vmatmul.mubr.msk.f32.gmra.mrb[4].mxu0 %vm409_vm13, %v396_v52 }
 0x1be   :  { %1864 = vmatprep.mubr.msk.f32.mxu0 %vm409_vm13, %v397_v53 }
 0x1c1   :  { %1865 = vmatmul.mubr.msk.f32.gmra.mrb[6].mxu0 %vm409_vm13, %v398_v54 }
 0x1c2   :  { %1867 = vmatprep.mubr.msk.f32.mxu0 %vm409_vm13, %v399_v55 }
 0x1c5   :  { %1868 = vmatmul.mubr.msk.f32.gmra.mrb[8].mxu0 %vm409_vm13, %v400_v56 }
 0x1de   :  { %v2320_v57 = vpop.f32.mrb[0].mxu0 }
 0x1df   :  { %v2322_v58 = vpop.f32.mrb[1].mxu0 }
 0x223   :  { %v2091_v59 = vpop.permute.xlu0 %2090 }
 0x224   :  { %v2093_v60 = vunpack.i.h.bf16 %v2091_v59  ;;  %v2092_v61 = vunpack.i.l.bf16 %v2091_v59 }
 0x226   :  { %v2012_v62 = vpack.c.bf16 %v2093_v60, %v2092_v61 }
 0x228   :  { %2014 = vmatprep.subr.msk.bf16.mxu1 %vm2284_vm14, %v2012_v62 }
 0x229   :  { %2017 = vmatpush3.bf16.xpose.msk.msra.mxu1 %vm2284_vm14, %v2012_v62 }
 0x230   :  { %1875 = vmatmul.mubr.msk.f32.vlgmr.msra.gmra.mrb[4].mxu1 %vm409_vm13, %v394_v50  ;;  %v2368_v50 = vshrl.u32 %v18_v21, 7 }
 0x231   :  { %1877 = vmatprep.mubr.msk.f32.mxu1 %vm409_vm13, %v395_v51 }
 0x232   :  { %vm206_vm1 = vcmp.eq.s32.totalorder %v2368_v50, %v2219_v22 }
 0x234   :  { %1878 = vmatmul.mubr.msk.f32.gmra.mrb[6].mxu1 %vm409_vm13, %v396_v52 }
 0x235   :  { %1880 = vmatprep.mubr.msk.f32.mxu1 %vm409_vm13, %v397_v53  ;;  %v205_v53 = vadd.s32 8, %v2368_v50 }
 0x237   :  { %vm207_vm0 = vcmp.eq.s32.totalorder %v205_v53, %v2219_v22 }
 0x238   :  { %1881 = vmatmul.mubr.msk.f32.gmra.mrb[8].mxu1 %vm409_vm13, %v398_v54  ;;  %v1674_v54 = vsel %vm207_vm0, 1.0, %v2146_v25 }
 0x239   :  { %1883 = vmatprep.mubr.msk.f32.mxu1 %vm409_vm13, %v399_v55  ;;  %v213_v55 = vmax.f32 %v2320_v57, %v1674_v54 }
 0x23b   :  { %vm215_vm2 = vcmp.gt.f32.partialorder %v213_v55, 0.0 }
 0x23c   :  { %1884 = vmatmul.mubr.msk.f32.gmra.mrb[10].mxu1 %vm409_vm13, %v400_v56  ;;  %v1673_v56 = vsel %vm206_vm1, 1.0, %v2146_v25 }
 0x23d   :  { %v212_v21 = vmax.f32 %v2322_v58, %v1673_v56 }
 0x23f   :  { %vm214_vm4 = vcmp.gt.f32.partialorder %v212_v21, 0.0 }
 0x28c   :  { %v1860_v0 = vpop.f32.mrb[2].mxu0 }
 0x28d   :  { %v659_v2 = vmul.f32 %v1860_v0, %v402_v63  ;;  %v506_v3 = vpop.f32.mrb[3].mxu0  ;;  %v2149_v63 = vmov -1e+30  }
 0x28e   :  { %v658_v5 = vmul.f32 %v506_v3, %v401_v1  ;;  %v2380_v0 = vsel %vm215_vm2, 0.0, %v2149_v63 }
 0x28f   :  { %v669_v6 = vsel %vm84_vm15, %v659_v2, 0.0 }
 0x290   :  { %670 = vadd.xlane.f32.xlu0 %v669_v6  ;;  %v1863_v7 = vpop.f32.mrb[4].mxu0  ;;  %v666_v11 = vsel %vm84_vm15, %v658_v5, 0.0 }
 0x291   :  { %v661_v8 = vmul.f32 %v1863_v7, %v404_v4  ;;  %v516_v9 = vpop.f32.mrb[5].mxu0  ;;  %v2384_v7 = vsel %vm214_vm4, 0.0, %v2149_v63 }
 0x292   :  { %v660_v18 = vmul.f32 %v516_v9, %v403_v12 }
 0x293   :  { %v675_v15 = vsel %vm84_vm15, %v661_v8, 0.0 }
 0x294   :  { %667 = vadd.xlane.f32.xlu0 %v666_v11  ;;  %v1866_v13 = vpop.f32.mrb[6].mxu0  ;;  %v672_v28 = vsel %vm84_vm15, %v660_v18, 0.0 }
 0x295   :  { %v663_v14 = vmul.f32 %v1866_v13, %v406_v10  ;;  %v526_v16 = vpop.f32.mrb[7].mxu0 }
 0x296   :  { %v662_v23 = vmul.f32 %v526_v16, %v405_v17 }
 0x297   :  { %v681_v19 = vsel %vm84_vm15, %v663_v14, 0.0 }
 0x298   :  { %676 = vadd.xlane.f32.xlu0 %v675_v15  ;;  %682 = vadd.xlane.f32.xlu1 %v681_v19  ;;  %v1869_v20 = vpop.f32.mrb[8].mxu0  ;;  %v678_v34 = vsel %vm84_vm15, %v662_v23, 0.0 }
 0x299   :  { %v536_v24 = vpop.f32.mrb[9].mxu0  ;;  %v665_v39 = vmul.f32 %v1869_v20, %v408_v36 }
 0x29a   :  { %v664_v35 = vmul.f32 %v536_v24, %v407_v27 }
 0x29b   :  { %v687_v43 = vsel %vm84_vm15, %v665_v39, 0.0 }
 0x29c   :  { %673 = vadd.xlane.f32.xlu0 %v672_v28  ;;  %v684_v42 = vsel %vm84_vm15, %v664_v35, 0.0 }
 0x2a0   :  { %679 = vadd.xlane.f32.xlu0 %v678_v34 }
 0x2a4   :  { %685 = vadd.xlane.f32.xlu0 %v684_v42 }
 0x2a8   :  { %688 = vadd.xlane.f32.xlu0 %v687_v43 }
 0x303   :  { %v1876_v44 = vpop.f32.mrb[4].mxu1 }
 0x304   :  { %v619_v45 = vpop.f32.mrb[5].mxu1 }
 0x307   :  { %v1879_v46 = vpop.f32.mrb[6].mxu1 }
 0x308   :  { %v629_v47 = vpop.f32.mrb[7].mxu1 }
 0x30b   :  { %v1882_v48 = vpop.f32.mrb[8].mxu1 }
 0x30c   :  { %v639_v49 = vpop.f32.mrb[9].mxu1 }
 0x30f   :  { %v2370_v51 = vpop.f32.mrb[10].mxu1 }
 0x310   :  { %v649_v52 = vpop.f32.mrb[11].mxu1 }
 0x31d   :  { %v671_v59 = vpop.xlane.xlu0 %670 }
 0x31e   :  { %v691_v60 = vadd.f32 %v1876_v44, %v671_v59 }
 0x320   :  { %vm699_vm3 = vcmp.gt.f32.partialorder %v691_v60, 0.0  ;;  %v707_v61 = vmul.f32 0.2, %v691_v60 }
 0x321   :  { %v668_v62 = vpop.xlane.xlu0 %667 }
 0x322   :  { %v690_v1 = vadd.f32 %v668_v62, %v619_v45  ;;  %v715_v2 = vsel %vm699_vm3, %v691_v60, %v707_v61 }
 0x323   :  { %v723_v3 = vadd.f32 %v715_v2, %v2380_v0 }
 0x324   :  { %vm698_vm8 = vcmp.gt.f32.partialorder %v690_v1, 0.0  ;;  %v706_v57 = vmul.f32 0.2, %v690_v1 }
 0x325   :  { %v677_v4 = vpop.xlane.xlu0 %676  ;;  %v683_v5 = vpop.xlane.xlu1 %682  ;;  %v733_v6 = vsel %vm84_vm15, %v723_v3, -inf }
 0x326   :  { %v693_v58 = vadd.f32 %v1879_v46, %v677_v4  ;;  %v695_v8 = vadd.f32 %v1882_v48, %v683_v5  ;;  %734 = vmax.xlane.f32.xlu0 %v733_v6  ;;  %v714_v9 = vsel %vm698_vm8, %v690_v1, %v706_v57 }
 0x327   :  { %v722_v10 = vadd.f32 %v714_v9, %v2384_v7 }
 0x328   :  { %vm701_vm11 = vcmp.gt.f32.partialorder %v693_v58, 0.0  ;;  %v709_v11 = vmul.f32 0.2, %v693_v58  ;;  %v711_v14 = vmul.f32 0.2, %v695_v8  ;;  %vm703_vm13 = vcmp.gt.f32.partialorder %v695_v8, 0.0 }
 0x329   :  { %v674_v12 = vpop.xlane.xlu0 %673  ;;  %v730_v13 = vsel %vm84_vm15, %v722_v10, -inf }
 0x32a   :  { %v692_v15 = vadd.f32 %v674_v12, %v629_v47  ;;  %731 = vmax.xlane.f32.xlu0 %v730_v13  ;;  %v717_v16 = vsel %vm701_vm11, %v693_v58, %v709_v11  ;;  %v719_v27 = vsel %vm703_vm13, %v695_v8, %v711_v14 }
 0x32b   :  { %v725_v17 = vadd.f32 %v717_v16, %v2380_v0  ;;  %v727_v39 = vadd.f32 %v719_v27, %v2380_v0 }
 0x32c   :  { %vm700_vm14 = vcmp.gt.f32.partialorder %v692_v15, 0.0  ;;  %v708_v18 = vmul.f32 0.2, %v692_v15 }
 0x32d   :  { %v680_v19 = vpop.xlane.xlu0 %679  ;;  %v739_v20 = vsel %vm84_vm15, %v725_v17, -inf  ;;  %v745_v46 = vsel %vm84_vm15, %v727_v39, -inf }
 0x32e   :  { %v694_v23 = vadd.f32 %v680_v19, %v639_v49  ;;  %740 = vmax.xlane.f32.xlu0 %v739_v20  ;;  %v716_v24 = vsel %vm700_vm14, %v692_v15, %v708_v18 }
 0x32f   :  { %v724_v28 = vadd.f32 %v716_v24, %v2384_v7 }
 0x330   :  { %vm702_vm0 = vcmp.gt.f32.partialorder %v694_v23, 0.0  ;;  %v710_v34 = vmul.f32 0.2, %v694_v23 }
 0x331   :  { %v686_v35 = vpop.xlane.xlu0 %685  ;;  %v736_v36 = vsel %vm84_vm15, %v724_v28, -inf }
 0x332   :  { %v696_v42 = vadd.f32 %v686_v35, %v649_v52  ;;  %737 = vmax.xlane.f32.xlu0 %v736_v36  ;;  %v718_v43 = vsel %vm702_vm0, %v694_v23, %v710_v34 }
 0x333   :  { %v726_v47 = vadd.f32 %v718_v43, %v2384_v7 }
 0x334   :  { %vm704_vm1 = vcmp.gt.f32.partialorder %v696_v42, 0.0  ;;  %v712_v44 = vmul.f32 0.2, %v696_v42 }
 0x335   :  { %v689_v45 = vpop.xlane.xlu0 %688  ;;  %v742_v54 = vsel %vm84_vm15, %v726_v47, -inf }
 0x336   :  { %v697_v48 = vadd.f32 %v2370_v51, %v689_v45  ;;  %746 = vmax.xlane.f32.xlu0 %v745_v46  ;;  %v720_v49 = vsel %vm704_vm1, %v696_v42, %v712_v44 }
 0x337   :  { %v728_v55 = vadd.f32 %v720_v49, %v2384_v7 }
 0x338   :  { %vm705_vm2 = vcmp.gt.f32.partialorder %v697_v48, 0.0  ;;  %v713_v53 = vmul.f32 0.2, %v697_v48 }
 0x339   :  { %v748_v56 = vsel %vm84_vm15, %v728_v55, -inf }
 0x33a   :  { %743 = vmax.xlane.f32.xlu0 %v742_v54  ;;  %v721_v52 = vsel %vm705_vm2, %v697_v48, %v713_v53 }
 0x33b   :  { %v729_v59 = vadd.f32 %v721_v52, %v2380_v0 }
 0x33d   :  { %v751_v60 = vsel %vm84_vm15, %v729_v59, -inf }
 0x33e   :  { %749 = vmax.xlane.f32.xlu0 %v748_v56 }
 0x342   :  { %752 = vmax.xlane.f32.xlu0 %v751_v60 }
 0x3b3   :  { %v735_v21 = vpop.xlane.xlu0 %734 }
 0x3b4   :  { %v755_v51 = vsub.f32 %v723_v3, %v735_v21 }
 0x3b6   :  { %v764_v61 = vmul.f32 1.442695, %v755_v51 }
 0x3b7   :  { %v732_v62 = vpop.xlane.xlu0 %731 }
 0x3b8   :  { %2104 = vpow2.f32 %v764_v61  ;;  %v754_v63 = vsub.f32 %v722_v10, %v732_v62 }
 0x3ba   :  { %v762_v1 = vmul.f32 1.442695, %v754_v63 }
 0x3bb   :  { %v741_v2 = vpop.xlane.xlu0 %740 }
 0x3bc   :  { %2106 = vpow2.f32 %v762_v1  ;;  %v757_v57 = vsub.f32 %v725_v17, %v741_v2 }
 0x3be   :  { %v768_v4 = vmul.f32 1.442695, %v757_v57 }
 0x3bf   :  { %v738_v5 = vpop.xlane.xlu0 %737 }
 0x3c0   :  { %2108 = vpow2.f32 %v768_v4  ;;  %v756_v6 = vsub.f32 %v724_v28, %v738_v5 }
 0x3c2   :  { %v2105_v58 = vpop.eup %2104  ;;  %v766_v8 = vmul.f32 1.442695, %v756_v6 }
 0x3c3   :  { %v747_v9 = vpop.xlane.xlu0 %746  ;;  %v781_v11 = vsel %vm84_vm15, %v2105_v58, 0.0 }
 0x3c4   :  { %2110 = vpow2.f32 %v766_v8  ;;  %v759_v12 = vsub.f32 %v727_v39, %v747_v9  ;;  %782 = vadd.xlane.f32.xlu0 %v781_v11 }
 0x3c6   :  { %v2107_v3 = vpop.eup %2106  ;;  %v772_v13 = vmul.f32 1.442695, %v759_v12  ;;  %v947_v12 = vld [vmem:[%s2559_s2 + $0xf8] sm:$0xff] }
 0x3c7   :  { %v744_v14 = vpop.xlane.xlu0 %743  ;;  %v778_v10 = vsel %vm84_vm15, %v2107_v3, 0.0  ;;  %1918 = vmatprep.mubr.msk.f32.mxu1 %vm311_vm5, %v947_v12 }
 0x3c8   :  { %2112 = vpow2.f32 %v772_v13  ;;  %v758_v15 = vsub.f32 %v726_v47, %v744_v14  ;;  %779 = vadd.xlane.f32.xlu1 %v778_v10  ;;  %v1054_v13 = vld [vmem:[%s2559_s2 + $0x50] sm:$0xff]  ;;  %v1055_v14 = vld [vmem:[%s2559_s2 + $0x58] sm:$0xff] }
 0x3ca   :  { %v2109_v16 = vpop.eup %2108  ;;  %v770_v17 = vmul.f32 1.442695, %v758_v15  ;;  %v1056_v15 = vld [vmem:[%s2559_s2 + $0x60] sm:$0xff] }
 0x3cb   :  { %v750_v18 = vpop.xlane.xlu0 %749  ;;  %v787_v19 = vsel %vm84_vm15, %v2109_v16, 0.0 }
 0x3cc   :  { %2114 = vpow2.f32 %v770_v17  ;;  %v760_v20 = vsub.f32 %v728_v55, %v750_v18  ;;  %788 = vadd.xlane.f32.xlu0 %v787_v19  ;;  %v1057_v17 = vld [vmem:[%s2559_s2 + $0x68] sm:$0xff]  ;;  %v1058_v18 = vld [vmem:[%s2559_s2 + $0x70] sm:$0xff] }
 0x3cd   :  { %v2046_v19 = vpack.c.bf16 %v1058_v18, %v1057_v17 }
 0x3ce   :  { %v2111_v23 = vpop.eup %2110  ;;  %v774_v24 = vmul.f32 1.442695, %v760_v20  ;;  %v950_v20 = vld [vmem:[%s2559_s2 + $0x150] sm:$0xff] }
 0x3cf   :  { %v753_v27 = vpop.xlane.xlu0 %752  ;;  %v784_v28 = vsel %vm84_vm15, %v2111_v23, 0.0 }
 0x3d0   :  { %2116 = vpow2.f32 %v774_v24  ;;  %v761_v34 = vsub.f32 %v729_v59, %v753_v27  ;;  %785 = vadd.xlane.f32.xlu1 %v784_v28 }
 0x3d2   :  { %v2113_v35 = vpop.eup %2112  ;;  %v776_v36 = vmul.f32 1.442695, %v761_v34 }
 0x3d3   :  { %v793_v39 = vsel %vm84_vm15, %v2113_v35, 0.0 }
 0x3d4   :  { %2118 = vpow2.f32 %v776_v36  ;;  %794 = vadd.xlane.f32.xlu0 %v793_v39  ;;  %v952_v36 = vld [vmem:[%s2559_s2 + $0x160] sm:$0xff]  ;;  %v951_v39 = vld [vmem:[%s2559_s2 + $0x158] sm:$0xff] }
 0x3d6   :  { %v2115_v42 = vpop.eup %2114 }
 0x3d7   :  { %v790_v43 = vsel %vm84_vm15, %v2115_v42, 0.0 }
 0x3d8   :  { %791 = vadd.xlane.f32.xlu1 %v790_v43 }
 0x3da   :  { %v2117_v44 = vpop.eup %2116 }
 0x3db   :  { %v796_v45 = vsel %vm84_vm15, %v2117_v44, 0.0 }
 0x3dc   :  { %797 = vadd.xlane.f32.xlu1 %v796_v45 }
 0x3de   :  { %v2119_v46 = vpop.eup %2118 }
 0x3df   :  { %v799_v47 = vsel %vm84_vm15, %v2119_v46, 0.0 }
 0x3e0   :  { %800 = vadd.xlane.f32.xlu0 %v799_v47  ;;  %v954_v47 = vld [vmem:[%s2559_s2 + $0x170] sm:$0xff] }
 0x451   :  { %v783_v48 = vpop.xlane.xlu0 %782 }
 0x452   :  { %2120 = vrcp.f32 %v783_v48  ;;  %v953_v48 = vld [vmem:[%s2559_s2 + $0x168] sm:$0xff] }
 0x455   :  { %v780_v49 = vpop.xlane.xlu1 %779 }
 0x456   :  { %2122 = vrcp.f32 %v780_v49 }
 0x459   :  { %v789_v53 = vpop.xlane.xlu0 %788 }
 0x45a   :  { %2124 = vrcp.f32 %v789_v53 }
 0x45c   :  { %v2121_v55 = vpop.eup %2120 }
 0x45d   :  { %v786_v54 = vpop.xlane.xlu1 %785  ;;  %v811_v59 = vmul.f32 %v2121_v55, %v2105_v58 }
 0x45e   :  { %2126 = vrcp.f32 %v786_v54 }
 0x460   :  { %v2123_v52 = vpop.eup %2122 }
 0x461   :  { %v810_v56 = vmul.f32 %v2123_v52, %v2107_v3  ;;  %v795_v60 = vpop.xlane.xlu0 %794  ;;  %v1053_v3 = vld [vmem:[%s2559_s2 + $0x48] sm:$0xff] }
 0x462   :  { %2128 = vrcp.f32 %v795_v60  ;;  %v2038_v10 = vpack.c.bf16 %v1054_v13, %v1053_v3 }
 0x463   :  { %1890 = vmatprep.mubr.msk.f32.mxu0 %vm84_vm15, %v810_v56  ;;  %v956_v56 = vld [vmem:[%s2559_s2 + $0x180] sm:$0xff] }
 0x464   :  { %1891 = vmatmul.mubr.msk.f32.vlgmr.msra.gmra.mrb[10].mxu0 %vm84_vm15, %v811_v59  ;;  %v2125_v51 = vpop.eup %2124  ;;  %2039 = vmatprep.subr.bf16.mxu0 %v2038_v10  ;;  %v955_v59 = vld [vmem:[%s2559_s2 + $0x178] sm:$0xff] }
 0x465   :  { %v792_v21 = vpop.xlane.xlu1 %791  ;;  %v813_v1 = vmul.f32 %v2125_v51, %v2109_v16  ;;  %v2042_v16 = vpack.c.bf16 %v1056_v15, %v1055_v14  ;;  %2041 = vmatpush3.bf16.msra.mxu0 %v2038_v10 }
 0x466   :  { %2130 = vrcp.f32 %v792_v21 }
 0x467   :  { %2043 = vmatprep.subr.bf16.mxu0 %v2042_v16 }
 0x468   :  { %v2127_v61 = vpop.eup %2126 }
 0x469   :  { %v798_v62 = vpop.xlane.xlu1 %797  ;;  %v812_v63 = vmul.f32 %v2127_v61, %v2111_v23  ;;  %2045 = vmatpush3.bf16.msra.mxu0 %v2042_v16  ;;  %v949_v23 = vld [vmem:[%s2559_s2 + $0x148] sm:$0xff] }
 0x46a   :  { %2132 = vrcp.f32 %v798_v62  ;;  %2047 = vmatprep.subr.bf16.mxu0 %v2046_v19 }
 0x46b   :  { %1893 = vmatprep.mubr.msk.f32.mxu0 %vm84_vm15, %v812_v63  ;;  %v948_v63 = vld [vmem:[%s2559_s2 + $0x100] sm:$0xff] }
 0x46c   :  { %1894 = vmatmul.mubr.msk.f32.gmra.mrb[12].mxu0 %vm84_vm15, %v813_v1  ;;  %v2129_v57 = vpop.eup %2128  ;;  %v1059_v1 = vld [vmem:[%s2559_s2 + $0x78] sm:$0xff] }
 0x46d   :  { %v801_v2 = vpop.xlane.xlu0 %800  ;;  %v815_v6 = vmul.f32 %v2129_v57, %v2113_v35  ;;  %2049 = vmatpush3.bf16.msra.mxu0 %v2046_v19  ;;  %v1269_v19 = vsub.s32 1, %v2368_v50 }
 0x46e   :  { %2134 = vrcp.f32 %v801_v2  ;;  %v1060_v2 = vld [vmem:[%s2559_s2 + $0x80] sm:$0xff] }
 0x46f   :  { %v2050_v57 = vpack.c.bf16 %v1060_v2, %v1059_v1  ;;  %v1473_v1 = vld [vmem:[%s2559_s2 + $0xb0] sm:$0xff] }
 0x470   :  { %v2131_v4 = vpop.eup %2130 }
 0x471   :  { %v814_v5 = vmul.f32 %v2131_v4, %v2115_v42  ;;  %2051 = vmatprep.subr.bf16.mxu0 %v2050_v57  ;;  %v1142_v4 = vld [vmem:[%s2559_s2 + $0x88] sm:$0xff] }
 0x472   :  { %2053 = vmatpush3.bf16.msra.mxu0 %v2050_v57  ;;  %v1714_v57 = vld [vmem:[%s2559_s2 + $0x189] ss:$0 sm:$0xff] }
 0x473   :  { %1896 = vmatprep.mubr.msk.f32.mxu0 %vm84_vm15, %v814_v5  ;;  %v1143_v5 = vld [vmem:[%s2559_s2 + $0x90] sm:$0xff] }
 0x474   :  { %v2133_v58 = vpop.eup %2132  ;;  %1897 = vmatmul.mubr.msk.f32.gmra.mrb[14].mxu0 %vm84_vm15, %v815_v6  ;;  %v2054_v6 = vpack.c.bf16 %v1143_v5, %v1142_v4 }
 0x475   :  { %v816_v8 = vmul.f32 %v2133_v58, %v2117_v44  ;;  %v1707_v58 = vld [vmem:[%s2559_s2 + $0x188] ss:$0 sm:$0xff] }
 0x477   :  { %1899 = vmatprep.mubr.msk.f32.mxu0 %vm84_vm15, %v816_v8 }
 0x478   :  { %v2135_v9 = vpop.eup %2134 }
 0x479   :  { %v817_v11 = vmul.f32 %v2135_v9, %v2119_v46 }
 0x47b   :  { %1900 = vmatmul.mubr.msk.f32.gmra.mrb[16].mxu0 %vm84_vm15, %v817_v11 }
 0x537   :  { %v1892_v24 = vpop.f32.mrb[10].mxu0 }
 0x538   :  { %v958_v27 = vmul.f32 %v1892_v24, %v950_v20  ;;  %v908_v28 = vpop.f32.mrb[11].mxu0 }
 0x539   :  { %v957_v34 = vmul.f32 %v949_v23, %v908_v28 }
 0x53b   :  { %v2022_v35 = vpack.c.bf16 %v958_v27, %v957_v34 }
 0x53d   :  { %2023 = vmatprep.subr.bf16.mxu1 %v2022_v35 }
 0x53e   :  { %2025 = vmatpush3.bf16.msra.mxu1 %v2022_v35 }
 0x53f   :  { %v1895_v42 = vpop.f32.mrb[12].mxu0 }
 0x540   :  { %v960_v43 = vmul.f32 %v1895_v42, %v952_v36  ;;  %v918_v44 = vpop.f32.mrb[13].mxu0 }
 0x541   :  { %v959_v45 = vmul.f32 %v951_v39, %v918_v44 }
 0x543   :  { %v2026_v46 = vpack.c.bf16 %v960_v43, %v959_v45 }
 0x545   :  { %2027 = vmatprep.subr.bf16.mxu1 %v2026_v46 }
 0x546   :  { %2029 = vmatpush3.bf16.msra.mxu1 %v2026_v46 }
 0x547   :  { %v1898_v49 = vpop.f32.mrb[14].mxu0 }
 0x548   :  { %v962_v53 = vmul.f32 %v1898_v49, %v954_v47  ;;  %v928_v54 = vpop.f32.mrb[15].mxu0 }
 0x549   :  { %v961_v55 = vmul.f32 %v953_v48, %v928_v54 }
 0x54b   :  { %v2030_v52 = vpack.c.bf16 %v962_v53, %v961_v55 }
 0x54d   :  { %2031 = vmatprep.subr.bf16.mxu1 %v2030_v52 }
 0x54e   :  { %v1901_v60 = vpop.f32.mrb[16].mxu0  ;;  %2033 = vmatpush3.bf16.msra.mxu1 %v2030_v52 }
 0x54f   :  { %v964_v21 = vmul.f32 %v1901_v60, %v956_v56  ;;  %v938_v51 = vpop.f32.mrb[17].mxu0 }
 0x550   :  { %v963_v61 = vmul.f32 %v955_v59, %v938_v51  ;;  %v1660_v51 = vsel %vm33_vm6, 1.0, %v2146_v25 }
 0x552   :  { %v2034_v62 = vpack.c.bf16 %v964_v21, %v963_v61 }
 0x554   :  { %2035 = vmatprep.subr.bf16.mxu1 %v2034_v62 }
 0x555   :  { %2037 = vmatpush3.bf16.msra.mxu1 %v2034_v62  ;;  %v2062_v62 = vpack.c.bf16 %v1390_v38, %v1389_v37 }
 0x556   :  { %2055 = vmatprep.subr.bf16.mxu1 %v2054_v6 }
 0x558   :  { %1919 = vmatmul.mubr.msk.f32.vlgmr.msra.gmra.mrb[12].mxu1 %vm311_vm5, %v948_v63  ;;  %v1472_v63 = vld [vmem:[%s2559_s2 + $0xa8] sm:$0xff] }
 0x559   :  { %2057 = vmatpush3.bf16.msra.mxu1 %v2054_v6  ;;  %v2066_v2 = vpack.c.bf16 %v1473_v1, %v1472_v63 }
 0x62b   :  { %v1920_v8 = vpop.f32.mrb[12].mxu1 }
 0x62c   :  { %v1048_v9 = vadd.f32 %v1920_v8, %v1707_v58  ;;  %v1042_v11 = vpop.f32.mrb[13].mxu1 }
 0x62d   :  { %v1043_v12 = vadd.f32 %v1707_v58, %v1042_v11 }
 0x62e   :  { %v1052_v13 = vmax.f32 %v1048_v9, 0.0 }
 0x62f   :  { %v1051_v3 = vmax.f32 %v1043_v12, 0.0 }
 0x631   :  { %1937 = vmatprep.mubr.msk.f32.mxu0 %vm311_vm5, %v1051_v3 }
 0x632   :  { %1938 = vmatmul.mubr.msk.f32.vlgmr.msra.gmra.mrb[18].mxu0 %vm311_vm5, %v1052_v13 }
 0x705   :  { %v1939_v14 = vpop.f32.mrb[18].mxu0 }
 0x706   :  { %v1133_v10 = vpop.f32.mrb[19].mxu0 }
 0x707   :  { %v2058_v15 = vpack.c.bf16 %v1939_v14, %v1133_v10  ;;  %1944 = vmatprep.mubr.msk.f32.mxu1 %vm84_vm15, %v1133_v10 }
 0x708   :  { %1945 = vmatmul.mubr.msk.f32.vlgmr.msra.gmra.mrb[14].mxu1 %vm84_vm15, %v1939_v14 }
 0x709   :  { %2059 = vmatprep.subr.bf16.mxu1 %v2058_v15 }
 0x70a   :  { %2061 = vmatpush3.bf16.msra.mxu1 %v2058_v15  ;;  %v1661_v15 = vsel %vm34_vm9, 1.0, %v2146_v25 }
 0x70b   :  { %2063 = vmatprep.subr.bf16.mxu1 %v2062_v62 }
 0x7db   :  { %v1946_v16 = vpop.f32.mrb[14].mxu1 }
 0x7dc   :  { %1264 = vperm.xlu0 %2087, %v1946_v16   ;;  %v1216_v17 = vpop.f32.mrb[15].mxu1 }
 0x7dd   :  { %1259 = vperm.xlu1 %2088, %v1216_v17  }
 0x806   :  { %1225 = vxpose.xlu1.b32.start [1/2] (short) (narrow) %v1216_v17, 8 }
 0x80a   :  { %1226 = vxpose.xlu1.b32.end [2/2] (short) (narrow) %v1946_v16, 8 }
 0x85b   :  { %v1265_v24 = vpop.permute.xlu0 %1264 }
 0x85c   :  { %v1260_v18 = vpop.permute.xlu1 %1259 }
 0x886   :  { %v1241_v20 = vpop.trf.xlu1 }
 0x887   :  { %v1270_v23 = vrot.slane %v1241_v20, %v1269_v19 }
 0x889   :  { %v1271_v27 = vadd.f32 %v1270_v23, %v1260_v18  ;;  %v1272_v28 = vadd.f32 %v1270_v23, %v1265_v24  ;;  %v1662_v18 = vsel %vm35_vm10, 1.0, %v2146_v25 }
 0x88b   :  { %v1275_v34 = vmul.f32 0.2, %v1271_v27  ;;  %v1276_v35 = vmul.f32 0.2, %v1272_v28  ;;  %vm1273_vm5 = vcmp.gt.f32.partialorder %v1271_v27, 0.0  ;;  %vm1274_vm3 = vcmp.gt.f32.partialorder %v1272_v28, 0.0 }
 0x88d   :  { %v1277_v36 = vsel %vm1273_vm5, %v1271_v27, %v1275_v34  ;;  %v1278_v39 = vsel %vm1274_vm3, %v1272_v28, %v1276_v35 }
 0x88e   :  { %v1279_v42 = vadd.f32 %v1277_v36, %v2384_v7  ;;  %v1280_v44 = vadd.f32 %v1278_v39, %v2380_v0 }
 0x890   :  { %v1281_v43 = vsel %vm84_vm15, %v1279_v42, -inf  ;;  %v1284_v50 = vsel %vm84_vm15, %v1280_v44, -inf }
 0x891   :  { %1282 = vmax.xlane.f32.xlu0 %v1281_v43 }
 0x895   :  { %1285 = vmax.xlane.f32.xlu0 %v1284_v50 }
 0x91e   :  { %v1283_v45 = vpop.xlane.xlu0 %1282 }
 0x91f   :  { %v1287_v46 = vsub.f32 %v1279_v42, %v1283_v45 }
 0x921   :  { %v1289_v47 = vmul.f32 1.442695, %v1287_v46 }
 0x922   :  { %v1286_v48 = vpop.xlane.xlu0 %1285 }
 0x923   :  { %2136 = vpow2.f32 %v1289_v47  ;;  %v1288_v49 = vsub.f32 %v1280_v44, %v1286_v48 }
 0x925   :  { %v1291_v53 = vmul.f32 1.442695, %v1288_v49 }
 0x927   :  { %2138 = vpow2.f32 %v1291_v53 }
 0x92d   :  { %v2137_v54 = vpop.eup %2136 }
 0x92e   :  { %v1293_v55 = vsel %vm84_vm15, %v2137_v54, 0.0 }
 0x92f   :  { %1294 = vadd.xlane.f32.xlu0 %v1293_v55 }
 0x931   :  { %v2139_v7 = vpop.eup %2138 }
 0x932   :  { %v1296_v52 = vsel %vm84_vm15, %v2139_v7, 0.0 }
 0x933   :  { %1297 = vadd.xlane.f32.xlu1 %v1296_v52 }
 0x945   :  { %2095 = vrot.lane.b32.xlu0 %v2094_v30, %s2150_s29 }
 0x949   :  { %2100 = vrot.lane.b32.xlu0 %v2099_v33, %s2150_s29 }
 0x9bc   :  { %v1295_v0 = vpop.xlane.xlu0 %1294 }
 0x9bd   :  { %2140 = vrcp.f32 %v1295_v0 }
 0x9c0   :  { %v1298_v56 = vpop.xlane.xlu1 %1297  ;;  %v2096_v59 = vpop.permute.xlu0 %2095 }
 0x9c1   :  { %2142 = vrcp.f32 %v1298_v56  ;;  %v2098_v60 = vunpack.i.h.bf16 %v2096_v59  ;;  %v2097_v21 = vunpack.i.l.bf16 %v2096_v59 }
 0x9c3   :  { %v85_v29 = vsel %vm84_vm15, %v1659_v26, %v2097_v21  ;;  %v86_v30 = vsel %vm84_vm15, %v1660_v51, %v2098_v60 }
 0x9c4   :  { %1976 = vmatprep.mubr.msk.f32.mxu0 %vm121_vm12, %v85_v29  ;;  %v2101_v3 = vpop.permute.xlu0 %2100 }
 0x9c5   :  { %v2102_v10 = vunpack.i.l.bf16 %v2101_v3  ;;  %v2103_v16 = vunpack.i.h.bf16 %v2101_v3 }
 0x9c7   :  { %v2141_v31 = vpop.eup %2140  ;;  %v87_v17 = vsel %vm84_vm15, %v1661_v15, %v2102_v10  ;;  %v88_v19 = vsel %vm84_vm15, %v1662_v18, %v2103_v16 }
 0x9c8   :  { %v1301_v32 = vmul.f32 %v2141_v31, %v2137_v54 }
 0x9ca   :  { %1951 = vmatprep.mubr.msk.f32.mxu1 %vm84_vm15, %v1301_v32 }
 0x9cb   :  { %v2143_v33 = vpop.eup %2142 }
 0x9cc   :  { %v1302_v61 = vmul.f32 %v2143_v33, %v2139_v7 }
 0x9ce   :  { %1952 = vmatmul.mubr.msk.f32.vlgmr.msra.gmra.mrb[16].mxu1 %vm84_vm15, %v1302_v61 }
 0x9cf   :  { %2065 = vmatpush3.bf16.msra.mxu1 %v2062_v62 }
 0x9d0   :  { %2067 = vmatprep.subr.bf16.mxu1 %v2066_v2 }
 0xaa1   :  { %v1953_v4 = vpop.f32.mrb[16].mxu1 }
 0xaa2   :  { %v1380_v5 = vpop.f32.mrb[17].mxu1  ;;  %v1386_v58 = vadd.f32 %v1953_v4, %v1714_v57 }
 0xaa3   :  { %v1381_v6 = vadd.f32 %v1714_v57, %v1380_v5 }
 0xaa5   :  { %1958 = vmatprep.mubr.msk.f32.mxu1 %vm84_vm15, %v1381_v6 }
 0xaa6   :  { %1959 = vmatmul.mubr.msk.f32.vlgmr.msra.gmra.mrb[18].mxu1 %vm84_vm15, %v1386_v58 }
 0xaa7   :  { %2069 = vmatpush3.bf16.msra.mxu1 %v2066_v2  ;;  %1965 = vmatprep.mubr.msk.f32.mxu1 %vm84_vm15, %v1381_v6 }
 0xaaa   :  { %1966 = vmatmul.mubr.msk.f32.vlgmr.msra.gmra.mrb[20].mxu1 %vm84_vm15, %v1386_v58 }
 0xb79   :  { %v1960_v8 = vpop.f32.mrb[18].mxu1 }
 0xb7a   :  { %v1463_v9 = vpop.f32.mrb[19].mxu1 }
 0xb7b   :  { %v2070_v11 = vpack.c.bf16 %v1960_v8, %v1463_v9 }
 0xb7d   :  { %v1967_v12 = vpop.f32.mrb[20].mxu1  ;;  %2071 = vmatprep.subr.bf16.mxu0 %v2070_v11 }
 0xb7e   :  { %v1540_v13 = vpop.f32.mrb[21].mxu1  ;;  %2073 = vmatpush3.bf16.msra.mxu0 %v2070_v11 }
 0xb7f   :  { %v2074_v14 = vpack.c.bf16 %v1967_v12, %v1540_v13 }
 0xb81   :  { %2075 = vmatprep.subr.bf16.mxu0 %v2074_v14 }
 0xb82   :  { %2077 = vmatpush3.bf16.msra.mxu0 %v2074_v14 }
 0xb85   :  { %1977 = vmatmul.mubr.msk.f32.vlgmr.msra.gmra.mrb[20].mxu0 %vm121_vm12, %v86_v30 }
 0xb86   :  { %1979 = vmatprep.mubr.msk.f32.mxu0 %vm121_vm12, %v87_v17 }
 0xb89   :  { %1980 = vmatmul.mubr.msk.f32.gmra.mrb[22].mxu0 %vm121_vm12, %v88_v19 }
 0xc58   :  { %v1978_v20 = vpop.f32.mrb[20].mxu0 }
 0xc59   :  { %v1638_v23 = vadd.f32 %v1978_v20, %v1721_v40  ;;  %v1632_v24 = vpop.f32.mrb[21].mxu0 }
 0xc5a   :  { %v1633_v27 = vadd.f32 %v1721_v40, %v1632_v24 }
 0xc5b   :  { %1652 = vst [vmem:[%s2562_s3 + $0x8] sm:$0xff] %v1638_v23 }
 0xc5c   :  { %1651 = vst [vmem:[%s2562_s3] sm:$0xff] %v1633_v27  ;;  %v1981_v22 = vpop.f32.mrb[22].mxu0 }
 0xc5d   :  { %v1648_v25 = vadd.f32 %v1981_v22, %v1721_v40  ;;  %v1642_v41 = vpop.f32.mrb[23].mxu0 }
 0xc5e   :  { %v1643_v28 = vadd.f32 %v1721_v40, %v1642_v41 }
 0xc5f   :  { %1654 = vst [vmem:[%s2562_s3 + $0x18] sm:$0xff] %v1648_v25 }
 0xc60   :  { %1653 = vst [vmem:[%s2562_s3 + $0x10] sm:$0xff] %v1643_v28 }

</bundles_post_ra>
